<compile_context>
chip_gen: v7x
topology: tpu7x:2x2x1
jax: 0.10.0
libtpu: 0.0.40
codegen_flags: <defaults>
</compile_context>

<pallas_src>
import math

import jax
import jax.numpy as jnp
from jax.experimental import pallas as pl
from jax.experimental.pallas import tpu as pltpu


K = 5          # conv kernel size (1, 5)
PAD = K // 2   # 'same' padding along T
LANE = 128     # TPU lane width

_HI = jax.lax.Precision.HIGHEST  # pure-JAX reference only


def _rup(x, m):
    return (x + m - 1) // m * m


# ---------------------------------------------------------------------------
# Fused kernel: one sample per grid step, everything in VMEM / vregs
# ---------------------------------------------------------------------------
def _encoder_kernel(x_ref, lw_ref, lb_ref,
                    w1_ref, s1_ref, t1_ref,
                    w2_ref, s2_ref, t2_ref,
                    w3_ref, s3_ref, t3_ref,
                    alpha_ref,
                    enc_ref, i1_ref, i2_ref, i3_ref,
                    y1_scr, y2_scr, y3_scr):
    f32 = jnp.float32

    # ---- Linear: h = x @ Wl + bl  (one sample; rows = T) ----------------------
    x = x_ref[0]                                                   # (T, Cin0)
    h = jnp.dot(x, lw_ref[...], preferred_element_type=f32) + lb_ref[...]

    # ---- conv(1x5, 'same', no bias) + folded eval BatchNorm + activation ------
    def conv_bn_act(y_full, w_ref, s_ref, t_ref, act):
        cin = w_ref.shape[0] // K            # true (dense) input channel count
        y = y_full[:, :cin] if y_full.shape[1] != cin else y_full
        tt = y.shape[0]
        zpad = jnp.zeros((PAD, cin), f32)
        yp = jnp.concatenate([zpad, y, zpad], axis=0)              # (tt + 2*PAD, cin)
        # Dense value-built im2col: tap k occupies lanes [k*cin, (k+1)*cin).
        cols = jnp.concatenate([yp[k:k + tt, :] for k in range(K)], axis=1)
        out = jnp.dot(cols, w_ref[...], preferred_element_type=f32)
        out = out * s_ref[...] + t_ref[...]                        # folded eval BatchNorm
        if act == "tanh":
            return jnp.tanh(out)
        return jnp.where(out > 0, out, out * alpha_ref[...])       # PReLU (shared alpha)

    # ---- MaxPool1d(kernel_size=kpool, stride=2, return_indices=True) ----------
    def maxpool(y, y_scr, kpool):
        tt, oc = y.shape
        lout = (tt - kpool) // 2 + 1
        y_scr[...] = y                                             # park in VMEM scratch
        best = y_scr[pl.ds(0, lout, stride=2), :]                  # window offset j = 0
        bidx = jnp.zeros((lout, oc), jnp.int32)
        for j in range(1, kpool):
            cand = y_scr[pl.ds(j, lout, stride=2), :]
            take = cand > best        # strict '>' keeps the first max (PyTorch tie-break)
            best = jnp.where(take, cand, best)
            bidx = jnp.where(take, jnp.int32(j), bidx)
        base = 2 * jax.lax.broadcasted_iota(jnp.int32, (lout, oc), 0)
        return best, base + bidx                 # indices along the per-sample L axis

    # ---- stage 1 ----   (Dropout after pooling is identity in eval mode)
    x1 = conv_bn_act(h, w1_ref, s1_ref, t1_ref, "tanh")
    p1, idx1 = maxpool(x1, y1_scr, 2)
    # ---- stage 2 ----
    x2 = conv_bn_act(p1, w2_ref, s2_ref, t2_ref, "tanh")
    p2, idx2 = maxpool(x2, y2_scr, 4)
    # ---- stage 3 ----
    x3 = conv_bn_act(p2, w3_ref, s3_ref, t3_ref, "prelu")
    p3, idx3 = maxpool(x3, y3_scr, 2)

    # All writebacks are full 128-lane stores (padding sliced off in the wrapper).
    enc_ref[0] = p3.astype(enc_ref.dtype)
    i1_ref[0] = idx1
    i2_ref[0] = idx2
    i3_ref[0] = idx3


# ---------------------------------------------------------------------------
# Wrapper
# ---------------------------------------------------------------------------
def cnn_ae_encoder_forward(x, params):
    """x: (B, T, n_channels) -> (x_encoded (B, C_out, L3), [idx1, idx2, idx3]) as in PyTorch."""
    B, T, Cin0 = x.shape
    C1 = params["lin_w"].shape[1]
    C2 = params["w1"].shape[-1]
    C3 = params["w2"].shape[-1]
    C4 = params["w3"].shape[-1]
    L1 = (T - 2) // 2 + 1
    L2 = (L1 - 4) // 2 + 1
    L3 = (L2 - 2) // 2 + 1
    OC2, OC3, OC4 = _rup(C2, LANE), _rup(C3, LANE), _rup(C4, LANE)

    def pack_w(w, oc):
        # (K, Cin, Cout) -> (K*Cin, oc): dense tap packing along the contraction axis,
        # zero-padding only the OUTPUT channels up to a 128-lane multiple (free on MXU).
        kk, cin, cout = w.shape
        wp = jnp.reshape(w, (kk * cin, cout))
        return jnp.pad(wp, ((0, 0), (0, oc - cout)))

    def pad_row(v, oc):
        v = jnp.reshape(v, (1, -1))
        return jnp.pad(v, ((0, 0), (0, oc - v.shape[-1])))

    w1p = pack_w(params["w1"], OC2)
    w2p = pack_w(params["w2"], OC3)
    w3p = pack_w(params["w3"], OC4)

    flops = 2 * B * (T * Cin0 * C1 + T * K * C1 * OC2 + L1 * K * C2 * OC3 + L2 * K * C3 * OC4)
    transc = B * (T * OC2 + L1 * OC3)
    bytes_acc = 4 * (B * T * Cin0 + Cin0 * C1 + C1
                     + K * C1 * OC2 + K * C2 * OC3 + K * C3 * OC4
                     + 2 * (OC2 + OC3 + OC4) + 1
                     + B * (2 * L3 * OC4 + L1 * OC2 + L2 * OC3))

    enc, i1, i2, i3 = pl.pallas_call(
        _encoder_kernel,
        grid=(B,),
        out_shape=(jax.ShapeDtypeStruct((B, L3, OC4), jnp.float32),
                   jax.ShapeDtypeStruct((B, L1, OC2), jnp.int32),
                   jax.ShapeDtypeStruct((B, L2, OC3), jnp.int32),
                   jax.ShapeDtypeStruct((B, L3, OC4), jnp.int32)),
        in_specs=[pl.BlockSpec((1, T, Cin0), lambda b: (b, 0, 0)),    # x (one sample / step)
                  pl.BlockSpec((Cin0, C1), lambda b: (0, 0)),         # linear W
                  pl.BlockSpec((1, C1), lambda b: (0, 0)),            # linear b
                  pl.BlockSpec((K * C1, OC2), lambda b: (0, 0)),      # conv1 W (dense taps)
                  pl.BlockSpec((1, OC2), lambda b: (0, 0)),           # bn1 scale
                  pl.BlockSpec((1, OC2), lambda b: (0, 0)),           # bn1 shift
                  pl.BlockSpec((K * C2, OC3), lambda b: (0, 0)),      # conv2 W
                  pl.BlockSpec((1, OC3), lambda b: (0, 0)),
                  pl.BlockSpec((1, OC3), lambda b: (0, 0)),
                  pl.BlockSpec((K * C3, OC4), lambda b: (0, 0)),      # conv3 W
                  pl.BlockSpec((1, OC4), lambda b: (0, 0)),
                  pl.BlockSpec((1, OC4), lambda b: (0, 0)),
                  pl.BlockSpec((1, 1), lambda b: (0, 0))],            # PReLU alpha
        out_specs=(pl.BlockSpec((1, L3, OC4), lambda b: (b, 0, 0)),
                   pl.BlockSpec((1, L1, OC2), lambda b: (b, 0, 0)),
                   pl.BlockSpec((1, L2, OC3), lambda b: (b, 0, 0)),
                   pl.BlockSpec((1, L3, OC4), lambda b: (b, 0, 0))),
        scratch_shapes=[pltpu.VMEM((T, OC2), jnp.float32),            # pool-1 staging
                        pltpu.VMEM((L1, OC3), jnp.float32),           # pool-2 staging
                        pltpu.VMEM((L2, OC4), jnp.float32)],          # pool-3 staging
        compiler_params=pltpu.CompilerParams(dimension_semantics=("parallel",)),
        cost_estimate=pl.CostEstimate(flops=int(flops),
                                      transcendentals=int(transc),
                                      bytes_accessed=int(bytes_acc)),
    )(x,
      params["lin_w"], params["lin_b"].reshape(1, C1),
      w1p, pad_row(params["s1"], OC2), pad_row(params["t1"], OC2),
      w2p, pad_row(params["s2"], OC3), pad_row(params["t2"], OC3),
      w3p, pad_row(params["s3"], OC4), pad_row(params["t3"], OC4),
      jnp.asarray(params["prelu_alpha"], jnp.float32).reshape(1, 1))

    # back to the PyTorch (B, C, L) conventions; drop the lane padding
    x_encoded = jnp.transpose(enc[:, :, :C4], (0, 2, 1))
    indices = [jnp.transpose(i1[:, :, :C2], (0, 2, 1)),
               jnp.transpose(i2[:, :, :C3], (0, 2, 1)),
               jnp.transpose(i3[:, :, :C4], (0, 2, 1))]
    return x_encoded, indices


# ---------------------------------------------------------------------------
# Parameters (eval mode, BatchNorm folded to scale/shift)
# ---------------------------------------------------------------------------
def init_params(key, n_channels, out_channels=128):
    c0 = n_channels
    c1 = 2 * n_channels
    ks = jax.random.split(key, 20)
    eps = 1e-5

    def bn_fold(c, k1, k2, k3, k4):
        gamma = 1.0 + 0.1 * jax.random.normal(k1, (c,), jnp.float32)
        beta = 0.1 * jax.random.normal(k2, (c,), jnp.float32)
        mean = 0.1 * jax.random.normal(k3, (c,), jnp.float32)
        var = jax.random.uniform(k4, (c,), jnp.float32, minval=0.5, maxval=1.5)
        scale = gamma / jnp.sqrt(var + eps)
        shift = beta - mean * scale
        return scale, shift

    p = {}
    p["lin_w"] = jax.random.normal(ks[0], (c0, c1), jnp.float32) / math.sqrt(c0)
    p["lin_b"] = 0.1 * jax.random.normal(ks[1], (c1,), jnp.float32)
    # conv weights stored as (K, Cin, Cout)  (PyTorch Conv2d weight is (Cout, Cin, 1, K))
    p["w1"] = jax.random.normal(ks[2], (K, c1, 32), jnp.float32) / math.sqrt(K * c1)
    p["w2"] = jax.random.normal(ks[3], (K, 32, 64), jnp.float32) / math.sqrt(K * 32)
    p["w3"] = jax.random.normal(ks[4], (K, 64, out_channels), jnp.float32) / math.sqrt(K * 64)
    p["s1"], p["t1"] = bn_fold(32, *ks[5:9])
    p["s2"], p["t2"] = bn_fold(64, *ks[9:13])
    p["s3"], p["t3"] = bn_fold(out_channels, *ks[13:17])
    p["prelu_alpha"] = 0.25            # PyTorch PReLU default init
    return p


# ---------------------------------------------------------------------------
# Pure-JAX reference (independent formulation, for a correctness check)
# ---------------------------------------------------------------------------
def _ref_conv_bn_act(h, w, scale, shift, act, alpha=0.25):
    B, T, _ = h.shape
    Kk = w.shape[0]
    pad = Kk // 2
    hp = jnp.pad(h, ((0, 0), (pad, pad), (0, 0)))
    y = sum(jnp.einsum("btc,cd->btd", hp[:, k:k + T, :], w[k], precision=_HI)
            for k in range(Kk))
    y = y * scale + shift
    return jnp.tanh(y) if act == "tanh" else jnp.where(y > 0, y, alpha * y)


def _ref_pool(x, k):
    B, L, C = x.shape
    Lout = (L - k) // 2 + 1
    wins = jnp.stack([x[:, j:j + 2 * (Lout - 1) + 1:2, :] for j in range(k)], axis=-1)
    vals = wins.max(-1)
    arg = jnp.argmax(wins, axis=-1).astype(jnp.int32)
    idx = 2 * jnp.arange(Lout, dtype=jnp.int32)[None, :, None] + arg
    return vals, idx


def _ref_forward(x, params):
    h = jnp.einsum("btc,cd->btd", x, params["lin_w"], precision=_HI) + params["lin_b"]
    x1 = _ref_conv_bn_act(h, params["w1"], params["s1"], params["t1"], "tanh")
    p1, i1 = _ref_pool(x1, 2)
    x2 = _ref_conv_bn_act(p1, params["w2"], params["s2"], params["t2"], "tanh")
    p2, i2 = _ref_pool(x2, 4)
    x3 = _ref_conv_bn_act(p2, params["w3"], params["s3"], params["t3"], "prelu",
                          params["prelu_alpha"])
    p3, i3 = _ref_pool(x3, 2)
    return (jnp.transpose(p3, (0, 2, 1)),
            [jnp.transpose(i, (0, 2, 1)) for i in (i1, i2, i3)])


# ---------------------------------------------------------------------------
if __name__ == "__main__":
    key = jax.random.PRNGKey(0)
    k_in, k_par = jax.random.split(key)

    B, T, n_channels, out_channels = 2, 16, 4, 128
    x = jax.random.normal(k_in, (B, T, n_channels), jnp.float32)
    params = init_params(k_par, n_channels, out_channels)

    fwd = jax.jit(cnn_ae_encoder_forward)
    x_encoded, indices = fwd(x, params)
    jax.block_until_ready(x_encoded)
    jax.block_until_ready(indices)

    # correctness vs the pure-JAX reference
    ref_enc, ref_idx = _ref_forward(x, params)
    assert x_encoded.shape == (B, out_channels, 1), x_encoded.shape
    assert indices[0].shape == (B, 32, 8), indices[0].shape
    assert indices[1].shape == (B, 64, 3), indices[1].shape
    assert indices[2].shape == (B, out_channels, 1), indices[2].shape
    assert jnp.allclose(x_encoded, ref_enc, atol=1e-4, rtol=1e-4)
    for a, b in zip(indices, ref_idx):
        assert jnp.array_equal(a, b)

    print("KERNEL_OK")
</pallas_src>

<mosaic_0001>
module attributes {stable_mosaic.version = 11 : i64} {
  func.func @_encoder_kernel(%arg0: i32, %arg1: memref<1x16x4xf32, #tpu.memory_space<vmem>>, %arg2: memref<4x8xf32, #tpu.memory_space<vmem>>, %arg3: memref<1x8xf32, #tpu.memory_space<vmem>>, %arg4: memref<40x128xf32, #tpu.memory_space<vmem>>, %arg5: memref<1x128xf32, #tpu.memory_space<vmem>>, %arg6: memref<1x128xf32, #tpu.memory_space<vmem>>, %arg7: memref<160x128xf32, #tpu.memory_space<vmem>>, %arg8: memref<1x128xf32, #tpu.memory_space<vmem>>, %arg9: memref<1x128xf32, #tpu.memory_space<vmem>>, %arg10: memref<320x128xf32, #tpu.memory_space<vmem>>, %arg11: memref<1x128xf32, #tpu.memory_space<vmem>>, %arg12: memref<1x128xf32, #tpu.memory_space<vmem>>, %arg13: memref<1x1xf32, #tpu.memory_space<vmem>>, %arg14: memref<1x1x128xf32, #tpu.memory_space<vmem>>, %arg15: memref<1x8x128xi32, #tpu.memory_space<vmem>>, %arg16: memref<1x3x128xi32, #tpu.memory_space<vmem>>, %arg17: memref<1x1x128xi32, #tpu.memory_space<vmem>>, %arg18: memref<16x128xf32, #tpu.memory_space<vmem>>, %arg19: memref<8x128xf32, #tpu.memory_space<vmem>>, %arg20: memref<3x128xf32, #tpu.memory_space<vmem>>) attributes {dimension_semantics = [#tpu.dimension_semantics<parallel>], iteration_bounds = array<i64: 2>, scalar_prefetch = 0 : i64, scratch_operands = 3 : i64, tpu.core_type = #tpu.core_type<tc>, window_params = [{transform_indices = @transform_0, window_bounds = array<i64: 1, 16, 4>}, {pipeline_mode = #tpu.pipeline_mode<synchronous>, transform_indices = @transform_1, window_bounds = array<i64: 4, 8>}, {pipeline_mode = #tpu.pipeline_mode<synchronous>, transform_indices = @transform_2, window_bounds = array<i64: 1, 8>}, {pipeline_mode = #tpu.pipeline_mode<synchronous>, transform_indices = @transform_3, window_bounds = array<i64: 40, 128>}, {pipeline_mode = #tpu.pipeline_mode<synchronous>, transform_indices = @transform_4, window_bounds = array<i64: 1, 128>}, {pipeline_mode = #tpu.pipeline_mode<synchronous>, transform_indices = @transform_5, window_bounds = array<i64: 1, 128>}, {pipeline_mode = #tpu.pipeline_mode<synchronous>, transform_indices = @transform_6, window_bounds = array<i64: 160, 128>}, {pipeline_mode = #tpu.pipeline_mode<synchronous>, transform_indices = @transform_7, window_bounds = array<i64: 1, 128>}, {pipeline_mode = #tpu.pipeline_mode<synchronous>, transform_indices = @transform_8, window_bounds = array<i64: 1, 128>}, {pipeline_mode = #tpu.pipeline_mode<synchronous>, transform_indices = @transform_9, window_bounds = array<i64: 320, 128>}, {pipeline_mode = #tpu.pipeline_mode<synchronous>, transform_indices = @transform_10, window_bounds = array<i64: 1, 128>}, {pipeline_mode = #tpu.pipeline_mode<synchronous>, transform_indices = @transform_11, window_bounds = array<i64: 1, 128>}, {pipeline_mode = #tpu.pipeline_mode<synchronous>, transform_indices = @transform_12, window_bounds = array<i64: 1, 1>}, {transform_indices = @transform_13, window_bounds = array<i64: 1, 1, 128>}, {transform_indices = @transform_14, window_bounds = array<i64: 1, 8, 128>}, {transform_indices = @transform_15, window_bounds = array<i64: 1, 3, 128>}, {transform_indices = @transform_16, window_bounds = array<i64: 1, 1, 128>}]} {
    %c0 = arith.constant 0 : index
    %c0_0 = arith.constant 0 : index
    %c0_1 = arith.constant 0 : index
    %0 = vector.load %arg1[%c0, %c0_0, %c0_1] : memref<1x16x4xf32, #tpu.memory_space<vmem>>, vector<1x16x4xf32>
    %1 = vector.shape_cast %0 : vector<1x16x4xf32> to vector<16x4xf32>
    %c0_2 = arith.constant 0 : index
    %c0_3 = arith.constant 0 : index
    %2 = vector.load %arg2[%c0_2, %c0_3] : memref<4x8xf32, #tpu.memory_space<vmem>>, vector<4x8xf32>
    %cst = arith.constant dense<0.000000e+00> : vector<16x8xf32>
    %3 = tpu.matmul %1, %2, %cst {dimension_numbers = #tpu.dot_dimension_numbers<[1], [0], [0], [1], [0, 0, 1, 1], [], []>} : vector<16x4xf32>, vector<4x8xf32>, vector<16x8xf32> -> vector<16x8xf32>
    %c0_4 = arith.constant 0 : index
    %c0_5 = arith.constant 0 : index
    %4 = vector.load %arg3[%c0_4, %c0_5] : memref<1x8xf32, #tpu.memory_space<vmem>>, vector<1x8xf32>
    %5 = vector.broadcast %4 : vector<1x8xf32> to vector<16x8xf32>
    %6 = arith.addf %3, %5 : vector<16x8xf32>
    %cst_6 = arith.constant 0.000000e+00 : f32
    %7 = vector.broadcast %cst_6 : f32 to vector<2x8xf32>
    %8 = tpu.concatenate %7, %6, %7 in 0 : vector<2x8xf32>, vector<16x8xf32>, vector<2x8xf32> -> vector<20x8xf32>
    %9 = vector.extract_strided_slice %8 {offsets = [0, 0], sizes = [16, 8], strides = [1, 1]} : vector<20x8xf32> to vector<16x8xf32>
    %10 = vector.extract_strided_slice %8 {offsets = [1, 0], sizes = [16, 8], strides = [1, 1]} : vector<20x8xf32> to vector<16x8xf32>
    %11 = vector.extract_strided_slice %8 {offsets = [2, 0], sizes = [16, 8], strides = [1, 1]} : vector<20x8xf32> to vector<16x8xf32>
    %12 = vector.extract_strided_slice %8 {offsets = [3, 0], sizes = [16, 8], strides = [1, 1]} : vector<20x8xf32> to vector<16x8xf32>
    %13 = vector.extract_strided_slice %8 {offsets = [4, 0], sizes = [16, 8], strides = [1, 1]} : vector<20x8xf32> to vector<16x8xf32>
    %14 = tpu.concatenate %9, %10, %11, %12, %13 in 1 : vector<16x8xf32>, vector<16x8xf32>, vector<16x8xf32>, vector<16x8xf32>, vector<16x8xf32> -> vector<16x40xf32>
    %c0_7 = arith.constant 0 : index
    %c0_8 = arith.constant 0 : index
    %15 = vector.load %arg4[%c0_7, %c0_8] : memref<40x128xf32, #tpu.memory_space<vmem>>, vector<40x128xf32>
    %cst_9 = arith.constant dense<0.000000e+00> : vector<16x128xf32>
    %16 = tpu.matmul %14, %15, %cst_9 {dimension_numbers = #tpu.dot_dimension_numbers<[1], [0], [0], [1], [0, 0, 1, 1], [], []>} : vector<16x40xf32>, vector<40x128xf32>, vector<16x128xf32> -> vector<16x128xf32>
    %c0_10 = arith.constant 0 : index
    %c0_11 = arith.constant 0 : index
    %17 = vector.load %arg5[%c0_10, %c0_11] : memref<1x128xf32, #tpu.memory_space<vmem>>, vector<1x128xf32>
    %18 = vector.broadcast %17 : vector<1x128xf32> to vector<16x128xf32>
    %19 = arith.mulf %16, %18 : vector<16x128xf32>
    %c0_12 = arith.constant 0 : index
    %c0_13 = arith.constant 0 : index
    %20 = vector.load %arg6[%c0_12, %c0_13] : memref<1x128xf32, #tpu.memory_space<vmem>>, vector<1x128xf32>
    %21 = vector.broadcast %20 : vector<1x128xf32> to vector<16x128xf32>
    %22 = arith.addf %19, %21 : vector<16x128xf32>
    %23 = math.tanh %22 : vector<16x128xf32>
    %c0_14 = arith.constant 0 : index
    %c0_15 = arith.constant 0 : index
    %24 = vector.load %arg18[%c0_14, %c0_15] : memref<16x128xf32, #tpu.memory_space<vmem>>, vector<16x128xf32>
    tpu.vector_store %arg18[%c0_14, %c0_15], %23 {strides = array<i32>} : memref<16x128xf32, #tpu.memory_space<vmem>>, vector<16x128xf32>,
    %c0_16 = arith.constant 0 : index
    %c0_17 = arith.constant 0 : index
    %25 = tpu.strided_load %arg18[%c0_16, %c0_17] {strides = array<i32: 2, 1>} : memref<16x128xf32, #tpu.memory_space<vmem>>, vector<8x128xf32>
    %c0_i32 = arith.constant 0 : i32
    %26 = vector.broadcast %c0_i32 : i32 to vector<8x128xi32>
    %c1 = arith.constant 1 : index
    %c0_18 = arith.constant 0 : index
    %27 = tpu.strided_load %arg18[%c1, %c0_18] {strides = array<i32: 2, 1>} : memref<16x128xf32, #tpu.memory_space<vmem>>, vector<8x128xf32>
    %28 = arith.cmpf ogt, %27, %25 : vector<8x128xf32>
    %29 = arith.select %28, %27, %25 : vector<8x128xi1>, vector<8x128xf32>
    %c1_i32 = arith.constant 1 : i32
    %30 = vector.broadcast %c1_i32 : i32 to vector<8x128xi32>
    %31 = arith.select %28, %30, %26 : vector<8x128xi1>, vector<8x128xi32>
    %32 = tpu.iota {dimensions = array<i32: 0>} : vector<8x128xi32>
    %c2_i32 = arith.constant 2 : i32
    %33 = vector.broadcast %c2_i32 : i32 to vector<8x128xi32>
    %34 = arith.muli %33, %32 : vector<8x128xi32>
    %35 = arith.addi %34, %31 : vector<8x128xi32>
    %36 = vector.extract_strided_slice %29 {offsets = [0, 0], sizes = [8, 32], strides = [1, 1]} : vector<8x128xf32> to vector<8x32xf32>
    %cst_19 = arith.constant 0.000000e+00 : f32
    %37 = vector.broadcast %cst_19 : f32 to vector<2x32xf32>
    %38 = tpu.concatenate %37, %36, %37 in 0 : vector<2x32xf32>, vector<8x32xf32>, vector<2x32xf32> -> vector<12x32xf32>
    %39 = vector.extract_strided_slice %38 {offsets = [0, 0], sizes = [8, 32], strides = [1, 1]} : vector<12x32xf32> to vector<8x32xf32>
    %40 = vector.extract_strided_slice %38 {offsets = [1, 0], sizes = [8, 32], strides = [1, 1]} : vector<12x32xf32> to vector<8x32xf32>
    %41 = vector.extract_strided_slice %38 {offsets = [2, 0], sizes = [8, 32], strides = [1, 1]} : vector<12x32xf32> to vector<8x32xf32>
    %42 = vector.extract_strided_slice %38 {offsets = [3, 0], sizes = [8, 32], strides = [1, 1]} : vector<12x32xf32> to vector<8x32xf32>
    %43 = vector.extract_strided_slice %38 {offsets = [4, 0], sizes = [8, 32], strides = [1, 1]} : vector<12x32xf32> to vector<8x32xf32>
    %44 = tpu.concatenate %39, %40, %41, %42, %43 in 1 : vector<8x32xf32>, vector<8x32xf32>, vector<8x32xf32>, vector<8x32xf32>, vector<8x32xf32> -> vector<8x160xf32>
    %c0_20 = arith.constant 0 : index
    %c0_21 = arith.constant 0 : index
    %45 = vector.load %arg7[%c0_20, %c0_21] : memref<160x128xf32, #tpu.memory_space<vmem>>, vector<160x128xf32>
    %cst_22 = arith.constant dense<0.000000e+00> : vector<8x128xf32>
    %46 = tpu.matmul %44, %45, %cst_22 {dimension_numbers = #tpu.dot_dimension_numbers<[1], [0], [0], [1], [0, 0, 1, 1], [], []>} : vector<8x160xf32>, vector<160x128xf32>, vector<8x128xf32> -> vector<8x128xf32>
    %c0_23 = arith.constant 0 : index
    %c0_24 = arith.constant 0 : index
    %47 = vector.load %arg8[%c0_23, %c0_24] : memref<1x128xf32, #tpu.memory_space<vmem>>, vector<1x128xf32>
    %48 = vector.broadcast %47 : vector<1x128xf32> to vector<8x128xf32>
    %49 = arith.mulf %46, %48 : vector<8x128xf32>
    %c0_25 = arith.constant 0 : index
    %c0_26 = arith.constant 0 : index
    %50 = vector.load %arg9[%c0_25, %c0_26] : memref<1x128xf32, #tpu.memory_space<vmem>>, vector<1x128xf32>
    %51 = vector.broadcast %50 : vector<1x128xf32> to vector<8x128xf32>
    %52 = arith.addf %49, %51 : vector<8x128xf32>
    %53 = math.tanh %52 : vector<8x128xf32>
    %c0_27 = arith.constant 0 : index
    %c0_28 = arith.constant 0 : index
    %54 = vector.load %arg19[%c0_27, %c0_28] : memref<8x128xf32, #tpu.memory_space<vmem>>, vector<8x128xf32>
    tpu.vector_store %arg19[%c0_27, %c0_28], %53 {strides = array<i32>} : memref<8x128xf32, #tpu.memory_space<vmem>>, vector<8x128xf32>,
    %c0_29 = arith.constant 0 : index
    %c0_30 = arith.constant 0 : index
    %55 = tpu.strided_load %arg19[%c0_29, %c0_30] {strides = array<i32: 2, 1>} : memref<8x128xf32, #tpu.memory_space<vmem>>, vector<3x128xf32>
    %c0_i32_31 = arith.constant 0 : i32
    %56 = vector.broadcast %c0_i32_31 : i32 to vector<3x128xi32>
    %c1_32 = arith.constant 1 : index
    %c0_33 = arith.constant 0 : index
    %57 = tpu.strided_load %arg19[%c1_32, %c0_33] {strides = array<i32: 2, 1>} : memref<8x128xf32, #tpu.memory_space<vmem>>, vector<3x128xf32>
    %58 = arith.cmpf ogt, %57, %55 : vector<3x128xf32>
    %59 = arith.select %58, %57, %55 : vector<3x128xi1>, vector<3x128xf32>
    %c1_i32_34 = arith.constant 1 : i32
    %60 = vector.broadcast %c1_i32_34 : i32 to vector<3x128xi32>
    %61 = arith.select %58, %60, %56 : vector<3x128xi1>, vector<3x128xi32>
    %c2 = arith.constant 2 : index
    %c0_35 = arith.constant 0 : index
    %62 = tpu.strided_load %arg19[%c2, %c0_35] {strides = array<i32: 2, 1>} : memref<8x128xf32, #tpu.memory_space<vmem>>, vector<3x128xf32>
    %63 = arith.cmpf ogt, %62, %59 : vector<3x128xf32>
    %64 = arith.select %63, %62, %59 : vector<3x128xi1>, vector<3x128xf32>
    %c2_i32_36 = arith.constant 2 : i32
    %65 = vector.broadcast %c2_i32_36 : i32 to vector<3x128xi32>
    %66 = arith.select %63, %65, %61 : vector<3x128xi1>, vector<3x128xi32>
    %c3 = arith.constant 3 : index
    %c0_37 = arith.constant 0 : index
    %67 = tpu.strided_load %arg19[%c3, %c0_37] {strides = array<i32: 2, 1>} : memref<8x128xf32, #tpu.memory_space<vmem>>, vector<3x128xf32>
    %68 = arith.cmpf ogt, %67, %64 : vector<3x128xf32>
    %69 = arith.select %68, %67, %64 : vector<3x128xi1>, vector<3x128xf32>
    %c3_i32 = arith.constant 3 : i32
    %70 = vector.broadcast %c3_i32 : i32 to vector<3x128xi32>
    %71 = arith.select %68, %70, %66 : vector<3x128xi1>, vector<3x128xi32>
    %72 = tpu.iota {dimensions = array<i32: 0>} : vector<3x128xi32>
    %c2_i32_38 = arith.constant 2 : i32
    %73 = vector.broadcast %c2_i32_38 : i32 to vector<3x128xi32>
    %74 = arith.muli %73, %72 : vector<3x128xi32>
    %75 = arith.addi %74, %71 : vector<3x128xi32>
    %76 = vector.extract_strided_slice %69 {offsets = [0, 0], sizes = [3, 64], strides = [1, 1]} : vector<3x128xf32> to vector<3x64xf32>
    %cst_39 = arith.constant 0.000000e+00 : f32
    %77 = vector.broadcast %cst_39 : f32 to vector<2x64xf32>
    %78 = tpu.concatenate %77, %76, %77 in 0 : vector<2x64xf32>, vector<3x64xf32>, vector<2x64xf32> -> vector<7x64xf32>
    %79 = vector.extract_strided_slice %78 {offsets = [0, 0], sizes = [3, 64], strides = [1, 1]} : vector<7x64xf32> to vector<3x64xf32>
    %80 = vector.extract_strided_slice %78 {offsets = [1, 0], sizes = [3, 64], strides = [1, 1]} : vector<7x64xf32> to vector<3x64xf32>
    %81 = vector.extract_strided_slice %78 {offsets = [2, 0], sizes = [3, 64], strides = [1, 1]} : vector<7x64xf32> to vector<3x64xf32>
    %82 = vector.extract_strided_slice %78 {offsets = [3, 0], sizes = [3, 64], strides = [1, 1]} : vector<7x64xf32> to vector<3x64xf32>
    %83 = vector.extract_strided_slice %78 {offsets = [4, 0], sizes = [3, 64], strides = [1, 1]} : vector<7x64xf32> to vector<3x64xf32>
    %84 = tpu.concatenate %79, %80, %81, %82, %83 in 1 : vector<3x64xf32>, vector<3x64xf32>, vector<3x64xf32>, vector<3x64xf32>, vector<3x64xf32> -> vector<3x320xf32>
    %c0_40 = arith.constant 0 : index
    %c0_41 = arith.constant 0 : index
    %85 = vector.load %arg10[%c0_40, %c0_41] : memref<320x128xf32, #tpu.memory_space<vmem>>, vector<320x128xf32>
    %cst_42 = arith.constant dense<0.000000e+00> : vector<3x128xf32>
    %86 = tpu.matmul %84, %85, %cst_42 {dimension_numbers = #tpu.dot_dimension_numbers<[1], [0], [0], [1], [0, 0, 1, 1], [], []>} : vector<3x320xf32>, vector<320x128xf32>, vector<3x128xf32> -> vector<3x128xf32>
    %c0_43 = arith.constant 0 : index
    %c0_44 = arith.constant 0 : index
    %87 = vector.load %arg11[%c0_43, %c0_44] : memref<1x128xf32, #tpu.memory_space<vmem>>, vector<1x128xf32>
    %88 = vector.broadcast %87 : vector<1x128xf32> to vector<3x128xf32>
    %89 = arith.mulf %86, %88 : vector<3x128xf32>
    %c0_45 = arith.constant 0 : index
    %c0_46 = arith.constant 0 : index
    %90 = vector.load %arg12[%c0_45, %c0_46] : memref<1x128xf32, #tpu.memory_space<vmem>>, vector<1x128xf32>
    %91 = vector.broadcast %90 : vector<1x128xf32> to vector<3x128xf32>
    %92 = arith.addf %89, %91 : vector<3x128xf32>
    %cst_47 = arith.constant 0.000000e+00 : f32
    %93 = vector.broadcast %cst_47 : f32 to vector<3x128xf32>
    %94 = arith.cmpf ogt, %92, %93 : vector<3x128xf32>
    %c0_48 = arith.constant 0 : index
    %c0_49 = arith.constant 0 : index
    %95 = vector.load %arg13[%c0_48, %c0_49] : memref<1x1xf32, #tpu.memory_space<vmem>>, vector<1x1xf32>
    %96 = vector.broadcast %95 : vector<1x1xf32> to vector<3x128xf32>
    %97 = arith.mulf %92, %96 : vector<3x128xf32>
    %98 = arith.select %94, %92, %97 : vector<3x128xi1>, vector<3x128xf32>
    %c0_50 = arith.constant 0 : index
    %c0_51 = arith.constant 0 : index
    %99 = vector.load %arg20[%c0_50, %c0_51] : memref<3x128xf32, #tpu.memory_space<vmem>>, vector<3x128xf32>
    tpu.vector_store %arg20[%c0_50, %c0_51], %98 {strides = array<i32>} : memref<3x128xf32, #tpu.memory_space<vmem>>, vector<3x128xf32>,
    %c0_52 = arith.constant 0 : index
    %c0_53 = arith.constant 0 : index
    %100 = tpu.strided_load %arg20[%c0_52, %c0_53] {strides = array<i32: 2, 1>} : memref<3x128xf32, #tpu.memory_space<vmem>>, vector<1x128xf32>
    %c0_i32_54 = arith.constant 0 : i32
    %101 = vector.broadcast %c0_i32_54 : i32 to vector<1x128xi32>
    %c1_55 = arith.constant 1 : index
    %c0_56 = arith.constant 0 : index
    %102 = tpu.strided_load %arg20[%c1_55, %c0_56] {strides = array<i32: 2, 1>} : memref<3x128xf32, #tpu.memory_space<vmem>>, vector<1x128xf32>
    %103 = arith.cmpf ogt, %102, %100 : vector<1x128xf32>
    %104 = arith.select %103, %102, %100 : vector<1x128xi1>, vector<1x128xf32>
    %c1_i32_57 = arith.constant 1 : i32
    %105 = vector.broadcast %c1_i32_57 : i32 to vector<1x128xi32>
    %106 = arith.select %103, %105, %101 : vector<1x128xi1>, vector<1x128xi32>
    %107 = tpu.iota {dimensions = array<i32: 0>} : vector<1x128xi32>
    %c2_i32_58 = arith.constant 2 : i32
    %108 = vector.broadcast %c2_i32_58 : i32 to vector<1x128xi32>
    %109 = arith.muli %108, %107 : vector<1x128xi32>
    %110 = arith.addi %109, %106 : vector<1x128xi32>
    %c0_59 = arith.constant 0 : index
    %c0_60 = arith.constant 0 : index
    %c0_61 = arith.constant 0 : index
    %111 = vector.load %arg14[%c0_59, %c0_60, %c0_61] : memref<1x1x128xf32, #tpu.memory_space<vmem>>, vector<1x1x128xf32>
    %112 = vector.shape_cast %111 : vector<1x1x128xf32> to vector<1x128xf32>
    %113 = vector.shape_cast %104 : vector<1x128xf32> to vector<1x1x128xf32>
    tpu.vector_store %arg14[%c0_59, %c0_60, %c0_61], %113 {strides = array<i32>} : memref<1x1x128xf32, #tpu.memory_space<vmem>>, vector<1x1x128xf32>,
    %c0_62 = arith.constant 0 : index
    %c0_63 = arith.constant 0 : index
    %c0_64 = arith.constant 0 : index
    %114 = vector.load %arg15[%c0_62, %c0_63, %c0_64] : memref<1x8x128xi32, #tpu.memory_space<vmem>>, vector<1x8x128xi32>
    %115 = vector.shape_cast %114 : vector<1x8x128xi32> to vector<8x128xi32>
    %116 = vector.shape_cast %35 : vector<8x128xi32> to vector<1x8x128xi32>
    tpu.vector_store %arg15[%c0_62, %c0_63, %c0_64], %116 {strides = array<i32>} : memref<1x8x128xi32, #tpu.memory_space<vmem>>, vector<1x8x128xi32>,
    %c0_65 = arith.constant 0 : index
    %c0_66 = arith.constant 0 : index
    %c0_67 = arith.constant 0 : index
    %117 = vector.load %arg16[%c0_65, %c0_66, %c0_67] : memref<1x3x128xi32, #tpu.memory_space<vmem>>, vector<1x3x128xi32>
    %118 = vector.shape_cast %117 : vector<1x3x128xi32> to vector<3x128xi32>
    %119 = vector.shape_cast %75 : vector<3x128xi32> to vector<1x3x128xi32>
    tpu.vector_store %arg16[%c0_65, %c0_66, %c0_67], %119 {strides = array<i32>} : memref<1x3x128xi32, #tpu.memory_space<vmem>>, vector<1x3x128xi32>,
    %c0_68 = arith.constant 0 : index
    %c0_69 = arith.constant 0 : index
    %c0_70 = arith.constant 0 : index
    %120 = vector.load %arg17[%c0_68, %c0_69, %c0_70] : memref<1x1x128xi32, #tpu.memory_space<vmem>>, vector<1x1x128xi32>
    %121 = vector.shape_cast %120 : vector<1x1x128xi32> to vector<1x128xi32>
    %122 = vector.shape_cast %110 : vector<1x128xi32> to vector<1x1x128xi32>
    tpu.vector_store %arg17[%c0_68, %c0_69, %c0_70], %122 {strides = array<i32>} : memref<1x1x128xi32, #tpu.memory_space<vmem>>, vector<1x1x128xi32>,
    return
  }
  func.func @transform_0(%arg0: i32) -> (i32, i32, i32) {
    %c0_i32 = arith.constant 0 : i32
    %c0_i32_0 = arith.constant 0 : i32
    %c0_i32_1 = arith.constant 0 : i32
    return %arg0, %c0_i32, %c0_i32_0 : i32, i32, i32
  }
  func.func @transform_1(%arg0: i32) -> (i32, i32) {
    %c0_i32 = arith.constant 0 : i32
    %c0_i32_0 = arith.constant 0 : i32
    %c0_i32_1 = arith.constant 0 : i32
    return %c0_i32, %c0_i32_0 : i32, i32
  }
  func.func @transform_2(%arg0: i32) -> (i32, i32) {
    %c0_i32 = arith.constant 0 : i32
    %c0_i32_0 = arith.constant 0 : i32
    %c0_i32_1 = arith.constant 0 : i32
    return %c0_i32, %c0_i32_0 : i32, i32
  }
  func.func @transform_3(%arg0: i32) -> (i32, i32) {
    %c0_i32 = arith.constant 0 : i32
    %c0_i32_0 = arith.constant 0 : i32
    %c0_i32_1 = arith.constant 0 : i32
    return %c0_i32, %c0_i32_0 : i32, i32
  }
  func.func @transform_4(%arg0: i32) -> (i32, i32) {
    %c0_i32 = arith.constant 0 : i32
    %c0_i32_0 = arith.constant 0 : i32
    %c0_i32_1 = arith.constant 0 : i32
    return %c0_i32, %c0_i32_0 : i32, i32
  }
  func.func @transform_5(%arg0: i32) -> (i32, i32) {
    %c0_i32 = arith.constant 0 : i32
    %c0_i32_0 = arith.constant 0 : i32
    %c0_i32_1 = arith.constant 0 : i32
    return %c0_i32, %c0_i32_0 : i32, i32
  }
  func.func @transform_6(%arg0: i32) -> (i32, i32) {
    %c0_i32 = arith.constant 0 : i32
    %c0_i32_0 = arith.constant 0 : i32
    %c0_i32_1 = arith.constant 0 : i32
    return %c0_i32, %c0_i32_0 : i32, i32
  }
  func.func @transform_7(%arg0: i32) -> (i32, i32) {
    %c0_i32 = arith.constant 0 : i32
    %c0_i32_0 = arith.constant 0 : i32
    %c0_i32_1 = arith.constant 0 : i32
    return %c0_i32, %c0_i32_0 : i32, i32
  }
  func.func @transform_8(%arg0: i32) -> (i32, i32) {
    %c0_i32 = arith.constant 0 : i32
    %c0_i32_0 = arith.constant 0 : i32
    %c0_i32_1 = arith.constant 0 : i32
    return %c0_i32, %c0_i32_0 : i32, i32
  }
  func.func @transform_9(%arg0: i32) -> (i32, i32) {
    %c0_i32 = arith.constant 0 : i32
    %c0_i32_0 = arith.constant 0 : i32
    %c0_i32_1 = arith.constant 0 : i32
    return %c0_i32, %c0_i32_0 : i32, i32
  }
  func.func @transform_10(%arg0: i32) -> (i32, i32) {
    %c0_i32 = arith.constant 0 : i32
    %c0_i32_0 = arith.constant 0 : i32
    %c0_i32_1 = arith.constant 0 : i32
    return %c0_i32, %c0_i32_0 : i32, i32
  }
  func.func @transform_11(%arg0: i32) -> (i32, i32) {
    %c0_i32 = arith.constant 0 : i32
    %c0_i32_0 = arith.constant 0 : i32
    %c0_i32_1 = arith.constant 0 : i32
    return %c0_i32, %c0_i32_0 : i32, i32
  }
  func.func @transform_12(%arg0: i32) -> (i32, i32) {
    %c0_i32 = arith.constant 0 : i32
    %c0_i32_0 = arith.constant 0 : i32
    %c0_i32_1 = arith.constant 0 : i32
    return %c0_i32, %c0_i32_0 : i32, i32
  }
  func.func @transform_13(%arg0: i32) -> (i32, i32, i32) {
    %c0_i32 = arith.constant 0 : i32
    %c0_i32_0 = arith.constant 0 : i32
    %c0_i32_1 = arith.constant 0 : i32
    return %arg0, %c0_i32, %c0_i32_0 : i32, i32, i32
  }
  func.func @transform_14(%arg0: i32) -> (i32, i32, i32) {
    %c0_i32 = arith.constant 0 : i32
    %c0_i32_0 = arith.constant 0 : i32
    %c0_i32_1 = arith.constant 0 : i32
    return %arg0, %c0_i32, %c0_i32_0 : i32, i32, i32
  }
  func.func @transform_15(%arg0: i32) -> (i32, i32, i32) {
    %c0_i32 = arith.constant 0 : i32
    %c0_i32_0 = arith.constant 0 : i32
    %c0_i32_1 = arith.constant 0 : i32
    return %arg0, %c0_i32, %c0_i32_0 : i32, i32, i32
  }
  func.func @transform_16(%arg0: i32) -> (i32, i32, i32) {
    %c0_i32 = arith.constant 0 : i32
    %c0_i32_0 = arith.constant 0 : i32
    %c0_i32_1 = arith.constant 0 : i32
    return %arg0, %c0_i32, %c0_i32_0 : i32, i32, i32
  }
}

</mosaic_0001>

<bundles_post_ra>
// kernel: cnn_ae_encoder_forward.1
= control target key start
LH: loop header
LB: loop body
LE: loop exit
PB: predicated region body
PF: predicated region fallthrough
CT: control target
= control target key end

     0   :  { %s2303_s0 = inlined_call_operand.vmem [shape: f32[2,16,4], index: 0, kind: input, shape index: {}]   ;;  %s2304_s1 = inlined_call_operand.vmem [shape: f32[4,8], index: 1, kind: input, shape index: {}]   ;;  %s2305_s2 = inlined_call_operand.vmem [shape: f32[1,8], index: 2, kind: input, shape index: {}]   ;;  %s2306_s3 = inlined_call_operand.vmem [shape: f32[40,128], index: 3, kind: input, shape index: {}]   ;;  %s2307_s4 = inlined_call_operand.vmem [shape: f32[1,128], index: 4, kind: input, shape index: {}]   ;;  %s2308_s5 = inlined_call_operand.vmem [shape: f32[1,128], index: 5, kind: input, shape index: {}]   ;;  %s2309_s6 = inlined_call_operand.vmem [shape: f32[160,128], index: 6, kind: input, shape index: {}]   ;;  %s2310_s7 = inlined_call_operand.vmem [shape: f32[1,128], index: 7, kind: input, shape index: {}]   ;;  %s2311_s8 = inlined_call_operand.vmem [shape: f32[1,128], index: 8, kind: input, shape index: {}]   ;;  %s2312_s9 = inlined_call_operand.vmem [shape: f32[320,128], index: 9, kind: input, shape index: {}]   ;;  %s2313_s10 = inlined_call_operand.vmem [shape: f32[1,128], index: 10, kind: input, shape index: {}]   ;;  %s2314_s11 = inlined_call_operand.vmem [shape: f32[1,128], index: 11, kind: input, shape index: {}]   ;;  %s2315_s12 = inlined_call_operand.<no memory space> [shape: f32[1,1], index: 12, kind: input, shape index: {}]   ;;  %s2316_s13 = inlined_call_operand.hbm [shape: f32[2,1,128], index: 13, kind: output, shape index: {0}]   ;;  %s2317_s14 = inlined_call_operand.vmem [shape: s32[2,8,128], index: 14, kind: output, shape index: {1}]   ;;  %s2318_s15 = inlined_call_operand.vmem [shape: s32[2,3,128], index: 15, kind: output, shape index: {2}]   ;;  %s2319_s16 = inlined_call_operand.hbm [shape: s32[2,1,128], index: 16, kind: output, shape index: {3}]  }
   0x1   :  { %2326 = sst [smem:[#allocation16_spill]] %s2303_s0  ;;  %v22_v0 = vstv %s2315_s12 }
   0x2   :  { %2327 = sst [smem:[#allocation17_spill]] %s2304_s1  ;;  %23 = vst [vmem:[#allocation5] sm:$0x1] %v22_v0 }
   0x3   :  { %2328 = sst [smem:[#allocation18_spill]] %s2305_s2 }
   0x4   :  { %24 = vsyncpa [#allocation7], 0 }
   0x5   :  { %26 = vsyncpa [#allocation7 + $0x1], 0 }
   0x6   :  { %27 = vsyncpa [#allocation9], 0 }
   0x7   :  { %29 = vsyncpa [#allocation9 + $0x1], 0  ;;  %s1878_s23 = smov 0   ;;  %s1880_s24 = smov 0  }
   0x8   :  { %s1882_s25 = smov 0   ;;  %s1884_s26 = smov 0  }
   0x9 LB: > { %2329 = sst [smem:[#allocation12_spill]] %s1772_s25  ;;  %s1899_s12 = sadd.s32 4294967295, %s1776_s26   ;;  %s1776_s26 = sphi %s1884_s26, %s2341_s26   ;;  %s1772_s25 = sphi %s1882_s25, %s2343_s25   ;;  %s1768_s24 = sphi %s1880_s24, %s2345_s24   ;;  %s1764_s23 = sphi %s1878_s23, %s2344_s23  }
   0xa   : > { %s1415_s27 = sadd.s32 4294967294, %s1776_s26   ;;  %s1903_s28 = sadd.s32 1, %s1776_s26  }
   0xb   : > { %2330 = sst [smem:[#allocation13_spill]] %s1903_s28  ;;  %s320_s29 = sadd.s32 1, %s1772_s25 }
   0xc   : > { %s317_s30 = ssub.s32 %s1776_s26, %s1903_s28  ;;  %p330_p0 = scmp.ne.s32.totalorder %s1772_s25, %s1768_s24 }
   0xd   : > { %p318_p1 = scmp.eq.s32.totalorder %s317_s30, 0  ;;  %p331_p2 = scmp.eq.s32.totalorder %s1899_s12, 1 }
   0xe   : > { %p336_p3 = scmp.ne.s32.totalorder %s1768_s24, %s1764_s23  ;;  %p337_p4 = scmp.eq.s32.totalorder %s1415_s27, 1 }
   0xf   : > { %s1914_s0 = scalar_select %p318_p1, %s1772_s25, %s320_s29  }
  0x10   : > { %p1916_p5 = por %p331_p2, %p330_p0  ;;  %p1920_p6 = por %p337_p4, %p336_p3 }
  0x11   : > { %2331 = sst [smem:[#allocation14_spill]] %s1914_s0  ;;  %p1418_p7 = scmp.ge.s32.totalorder %s1776_s26, 1 }
  0x12   : > { %s2333_s18 = scalar_select %p1920_p6, 1, 0 }
  0x13   : > { %p477_p8 = scmp.lt.s32.totalorder %s1776_s26, 3 }
  0x14   : > { %2334 = sst [smem:[#allocation15_spill]] %s2333_s18 }
  0x15   : > { %p478_p9 = pnand %p1418_p7, %p477_p8 }
  0x16   : > { %s2335_s1 = sld [smem:[#allocation17_spill]] (!%p478_p9)  ;;  %vm568_vm0 = vcmask (!%p478_p9), 1043456   ;;  %p538_p10 = scmp.lt.s32.totalorder (!%p478_p9), %s1899_s12, 1  ;;  %vm561_vm1 = vcmask (!%p478_p9), 31744   ;;  %v719_v8 = vld [vmem:[%s2306_s3] sm:$0xff] (!%p478_p9)  ;;  %v720_v9 = vld [vmem:[%s2306_s3 + $0x8] sm:$0xff] (!%p478_p9) }
  0x17   : > { %481 = sbr.rel (%p478_p9) target bundleno = 1390 (0x56e), region = 72  ;;  %s2336_s30 = sld [smem:[#allocation16_spill]] (!%p478_p9)  ;;  %v1534_v11 = vpack.c.bf16 (!%p478_p9), %v720_v9, %v719_v8  ;;  %vm649_vm2 = vcmask (!%p478_p9), 1041408   ;;  %vm672_vm3 = vcmask (!%p478_p9), 1045504   ;;  %vm660_vm4 = vcmask (!%p478_p9), 1046528   ;;  %v721_v21 = vld [vmem:[%s2306_s3 + $0x10] sm:$0xff] (!%p478_p9) }
  0x18   : > { %s2337_s2 = sld [smem:[#allocation18_spill]] (!%p478_p9)  ;;  %v722_v22 = vld [vmem:[%s2306_s3 + $0x18] sm:$0xff] (!%p478_p9)  ;;  %s1778_s18 = smov (!%p478_p9), 16   ;;  %v723_v33 = vld [vmem:[%s2306_s3 + $0x20] sm:$0xff] (!%p478_p9)  ;;  %vm684_vm5 = vcmask (!%p478_p9), 1044480   ;;  %vm707_vm6 = vcmask (!%p478_p9), 64512  }
  0x19   : > { %v1538_v27 = vpack.c.bf16 (!%p478_p9), %v722_v22, %v721_v21  ;;  %s1781_s19 = smov (!%p478_p9), 32   ;;  %vm710_vm7 = vcmask (!%p478_p9), 130048   ;;  %vm713_vm8 = vcmask (!%p478_p9), 195584   ;;  %vm716_vm9 = vcmask (!%p478_p9), 261120   ;;  %v871_v58 = vld [vmem:[%s2309_s6] sm:$0xff] (!%p478_p9)  ;;  %v872_v59 = vld [vmem:[%s2309_s6 + $0x8] sm:$0xff] (!%p478_p9) }
  0x1a   : > { %vm724_vm10 = vcmask (!%p478_p9), 326656   ;;  %v1782_v57 = vmov (!%p478_p9), 0   ;;  %v873_v60 = vld [vmem:[%s2309_s6 + $0x10] sm:$0xff] (!%p478_p9)  ;;  %v1783_v61 = vmov (!%p478_p9), 0.0|0.0   ;;  %v1543_v62 = vpack.c.bf16 (!%p478_p9), %v872_v59, %v871_v58  ;;  %v874_v63 = vld [vmem:[%s2309_s6 + $0x18] sm:$0xff] (!%p478_p9)  ;;  %v880_v8 = vld [vmem:[%s2309_s6 + $0x48] sm:$0xff] (!%p478_p9) }
  0x1b   : > { %1675 = vset.pattern.permute.xlu0 (!%p478_p9), %v1782_v57  ;;  %1542 = vmatprep.subr.bf16.mxu0 (!%p478_p9), %v1783_v61  ;;  %v1546_v0 = vpack.c.bf16 (!%p478_p9), %v874_v63, %v873_v60  ;;  %v1429_v22 = vld [vmem:[%s2307_s4] ss:$0 sm:$0xff] (!%p478_p9)  ;;  %s2324_s29 = smov (!%p478_p9), 64   ;;  %vm867_vm12 = vcmask (!%p478_p9), 523264   ;;  %vm869_vm13 = vcmask (!%p478_p9), 785408   ;;  %vm1786_vm14 = vmmov (!%p478_p9), 0  }
  0x1c   : > { %v553_v1 = vld [vmem:[%s2335_s1] sm:$0xf] (!%p478_p9)  ;;  %1544 = vmatpush1.bf16.msra.mxu0 (!%p478_p9), %v1543_v62 }
  0x1d   : > { %1497 = vmatprep.subr.msk.mxu1 (!%p478_p9), %vm568_vm0, %v553_v1  ;;  %1545 = vmatprep.subr.bf16.mxu0 (!%p478_p9), %v1783_v61 }
  0x1e   : > { %1498 = vmatpush3.msk.msra.mxu1 %vm568_vm0, %v553_v1  ;;  %s1933_s21 = scalar_select %p538_p10, %s1899_s12, 1  ;;  %v1423_v4 = vld [vmem:[%s2337_s2] ss:$0 sm:$0xff] }
  0x1f   : > { %1535 = vmatprep.subr.bf16.mxu1 %v1534_v11  ;;  %v875_v1 = vld [vmem:[%s2309_s6 + $0x20] sm:$0xff] }
  0x20   : > { %s1442_s22 = sshll.u32 %s1933_s21, 4  ;;  %1547 = vmatpush1.bf16.msra.mxu0 %v1546_v0 }
  0x21   : > { %s542_s0 = scalar_lea.vmem %s2336_s30, %s1442_s22  ;;  %s1779_s22 = smov 8   ;;  %1548 = vmatprep.subr.bf16.mxu0 %v1783_v61 }
  0x22   : > { %v551_v2 = vld [vmem:[%s542_s0] sm:$0xff]  ;;  %v552_v3 = vld [vmem:[%s542_s0 + $0x8] sm:$0xff]  ;;  %s1780_s30 = smov 24   ;;  %s1421_s0 = sshll.u32 %s1933_s21, 3 }
  0x23   : > { %1499 = vmatprep.mubr.msk.f32.mxu1 %vm561_vm1, %v551_v2  ;;  %v876_v2 = vld [vmem:[%s2309_s6 + $0x28] sm:$0xff]  ;;  %s546_s27 = scalar_lea.vmem %s2317_s14, %s1421_s0  ;;  %s2217_s0 = sand.u32 1, %s1768_s24  }
  0x24   : > { %1500 = vmatmul.mubr.msk.f32.vlgmr.msra.gmra.mrb[0].mxu1 %vm561_vm1, %v552_v3  ;;  %v1549_v3 = vpack.c.bf16 %v876_v2, %v875_v1  ;;  %v1049_v2 = vld [vmem:[%s2312_s9 + $0x100] sm:$0xff] }
  0x25   : > { %1537 = vmatpush3.bf16.msra.mxu1 %v1534_v11  ;;  %v882_v11 = vld [vmem:[%s2309_s6 + $0x58] sm:$0xff] }
  0x26   : > { %1539 = vmatprep.subr.bf16.mxu1 %v1538_v27  ;;  %1550 = vmatpush1.bf16.msra.mxu0 %v1549_v3  ;;  %v1050_v3 = vld [vmem:[%s2312_s9 + $0x108] sm:$0xff] }
  0x27   : > { %1551 = vmatprep.subr.bf16.mxu0 %v1783_v61 }
  0x29   : > { %1541 = vmatpush3.bf16.msra.mxu1 %v1538_v27 }
  0x2a   : > { %1510 = vmatprep.subr.mxu1 %v723_v33 }
  0x2d   : > { %1511 = vmatpush3.msra.mxu1 %v723_v33 }
  0xf7   : > { %v1501_v5 = vpop.f32.mrb[0].mxu1 }
  0xf8   : > { %v644_v6 = vadd.f32 %v1501_v5, %v1423_v4  ;;  %v638_v7 = vpop.f32.mrb[1].mxu1  ;;  %v878_v5 = vld [vmem:[%s2309_s6 + $0x38] sm:$0xff] }
  0xf9   : > { %v639_v10 = vadd.f32 %v1423_v4, %v638_v7  ;;  %v877_v4 = vld [vmem:[%s2309_s6 + $0x30] sm:$0xff]  ;;  %v879_v7 = vld [vmem:[%s2309_s6 + $0x40] sm:$0xff] }
  0xfa   : > { %v651_v12 = vrot.slane %v644_v6, 6  ;;  %v1552_v6 = vpack.c.bf16 %v878_v5, %v877_v4  ;;  %v1555_v9 = vpack.c.bf16 %v880_v8, %v879_v7  ;;  %v1051_v4 = vld [vmem:[%s2312_s9 + $0x110] sm:$0xff]  ;;  %v1605_v5 = vpack.c.bf16 %v1050_v3, %v1049_v2 }
  0xfb   : > { %v650_v13 = vrot.slane %v639_v10, 6  ;;  %v881_v10 = vld [vmem:[%s2309_s6 + $0x50] sm:$0xff]  ;;  %v1787_v7 = vmov 0.0  }
  0xfc   : > { %v657_v14 = vsel %vm649_vm2, %v651_v12, 0.0  ;;  %1553 = vmatpush1.bf16.msra.mxu0 %v1552_v6  ;;  %v1052_v6 = vld [vmem:[%s2312_s9 + $0x118] sm:$0xff] }
  0xfd   : > { %v652_v15 = vsel %vm649_vm2, %v650_v13, %v651_v12  ;;  %v656_v16 = vsel %vm649_vm2, 0.0, %v650_v13  ;;  %v676_v25 = vrot.slane %v657_v14, 2  ;;  %v664_v26 = vrot.slane %v657_v14, 1  ;;  %1554 = vmatprep.subr.bf16.mxu0 %v1783_v61  ;;  %v883_v13 = vld [vmem:[%s2309_s6 + $0x60] sm:$0xff] }
  0xfe   : > { %v673_v17 = vrot.slane %v656_v16, 2  ;;  %v674_v18 = vrot.slane %v652_v15, 2  ;;  %v661_v19 = vrot.slane %v656_v16, 1  ;;  %v662_v20 = vrot.slane %v652_v15, 1 }
  0xff   : > { %v686_v28 = vrot.slane %v652_v15, 3  ;;  %v688_v31 = vrot.slane %v657_v14, 3  ;;  %v685_v32 = vrot.slane %v656_v16, 3  ;;  %v697_v34 = vrot.slane %v652_v15, 4 }
 0x100   : > { %v675_v23 = vsel %vm672_vm3, %v673_v17, %v674_v18  ;;  %v663_v24 = vsel %vm660_vm4, %v661_v19, %v662_v20  ;;  %v677_v29 = vsel %vm672_vm3, %v674_v18, %v676_v25  ;;  %v665_v30 = vsel %vm660_vm4, %v662_v20, %v664_v26  ;;  %1556 = vmatpush1.bf16.msra.mxu0 %v1555_v9  ;;  %v886_v17 = vld [vmem:[%s2309_s6 + $0x78] sm:$0xff]  ;;  %v887_v19 = vld [vmem:[%s2309_s6 + $0x80] sm:$0xff]  ;;  %v888_v20 = vld [vmem:[%s2309_s6 + $0x88] sm:$0xff] }
 0x101   : > { %678 = vrot.lane.b32.xlu1 %v675_v23, %s1778_s18  ;;  %666 = vrot.lane.b32.xlu0 %v663_v24, %s1779_s22  ;;  %v689_v35 = vsel %vm684_vm5, %v686_v28, %v688_v31  ;;  %v687_v36 = vsel %vm684_vm5, %v685_v32, %v686_v28  ;;  %v699_v37 = vrot.slane %v657_v14, 4  ;;  %v696_v38 = vrot.slane %v656_v16, 4  ;;  %v884_v14 = vld [vmem:[%s2309_s6 + $0x68] sm:$0xff]  ;;  %v1430_v24 = vld [vmem:[%s2308_s5] ss:$0 sm:$0xff] }
 0x102   : > { %v1558_v12 = vpack.c.bf16 %v882_v11, %v881_v10  ;;  %1557 = vmatprep.subr.bf16.mxu0 %v1783_v61  ;;  %v1567_v21 = vpack.c.bf16 %v888_v20, %v887_v19  ;;  %v834_v31 = vlaneseq  ;;  %v1608_v8 = vpack.c.bf16 %v1052_v6, %v1051_v4  ;;  %v1053_v9 = vld [vmem:[%s2312_s9 + $0x120] sm:$0xff]  ;;  %v1054_v10 = vld [vmem:[%s2312_s9 + $0x128] sm:$0xff]  ;;  %v1036_v20 = vld [vmem:[%s2312_s9 + $0x98] sm:$0xff] }
 0x103   : > { %v700_v39 = vsel %vm568_vm0, %v697_v34, %v699_v37  ;;  %v698_v40 = vsel %vm568_vm0, %v696_v38, %v697_v34  ;;  %v889_v34 = vld [vmem:[%s2309_s6 + $0x90] sm:$0xff]  ;;  %v1611_v11 = vpack.c.bf16 %v1054_v10, %v1053_v9  ;;  %v1018_v19 = vld [vmem:[%s2312_s9 + $0x8] sm:$0xff] }
 0x104   : > { %1559 = vmatpush1.bf16.msra.mxu0 %v1558_v12  ;;  %v835_v33 = vshrl.u32 %v834_v31, 7  ;;  %v1055_v12 = vld [vmem:[%s2312_s9 + $0x130] sm:$0xff] }
 0x105   : > { %680 = vrot.lane.b32.xlu1 %v677_v29, %s1778_s18  ;;  %668 = vrot.lane.b32.xlu0 %v665_v30, %s1779_s22  ;;  %v1039_v31 = vld [vmem:[%s2312_s9 + $0xb0] sm:$0xff]  ;;  %s1422_s18 = sshll.u32 %s1933_s21, 2  ;;  %s2338_s21 = smov 64  }
 0x106   : > { %1560 = vmatprep.subr.bf16.mxu0 %v1783_v61  ;;  %v2050_v37 = vmul.u32 2, %v835_v33  ;;  %v1047_v6 = vld [vmem:[%s2312_s9 + $0xf0] sm:$0xff]  ;;  %s550_s1 = scalar_lea.vmem %s2318_s15, %s1422_s18  ;;  %s1438_s18 = sshll.u32 %s1899_s12, 4 }
 0x107   : > { %s519_s22 = scalar_lea.vmem [#allocation6], %s2217_s0  ;;  %s2236_s28 = scalar_lea.hbm %s2319_s16, %s1438_s18 }
 0x109   : > { %692 = vrot.lane.b32.xlu1 %v689_v35, %s1780_s30  ;;  %690 = vrot.lane.b32.xlu0 %v687_v36, %s1780_s30  ;;  %v890_v35 = vld [vmem:[%s2309_s6 + $0x98] sm:$0xff]  ;;  %s1785_s30 = smov 96  }
 0x10a   : > { %v1570_v36 = vpack.c.bf16 %v890_v35, %v889_v34  ;;  %v1023_v35 = vld [vmem:[%s2312_s9 + $0x30] sm:$0xff] }
 0x10d   : > { %703 = vrot.lane.b32.xlu1 %v700_v39, %s1781_s19  ;;  %701 = vrot.lane.b32.xlu0 %v698_v40, %s1781_s19 }
 0x173   : > { %v679_v41 = vpop.permute.xlu1 %678  ;;  %v667_v42 = vpop.permute.xlu0 %666 }
 0x174   : > { %v708_v45 = vsel %vm707_vm6, %v656_v16, %v667_v42  ;;  %v885_v16 = vld [vmem:[%s2309_s6 + $0x70] sm:$0xff] }
 0x175   : > { %v711_v50 = vsel %vm710_vm7, %v708_v45, %v679_v41  ;;  %v1564_v18 = vpack.c.bf16 %v886_v17, %v885_v16  ;;  %v1034_v16 = vld [vmem:[%s2312_s9 + $0x88] sm:$0xff]  ;;  %v1017_v17 = vld [vmem:[%s2312_s9] sm:$0xff] }
 0x177   : > { %v681_v43 = vpop.permute.xlu1 %680  ;;  %v669_v44 = vpop.permute.xlu0 %668 }
 0x178   : > { %v709_v46 = vsel %vm707_vm6, %v652_v15, %v669_v44  ;;  %v1561_v15 = vpack.c.bf16 %v884_v14, %v883_v13  ;;  %v1056_v13 = vld [vmem:[%s2312_s9 + $0x138] sm:$0xff] }
 0x179   : > { %v712_v49 = vsel %vm710_vm7, %v709_v46, %v681_v43  ;;  %v1614_v14 = vpack.c.bf16 %v1056_v13, %v1055_v12 }
 0x17a   : > { %1562 = vmatpush1.bf16.msra.mxu0 %v1561_v15  ;;  %v1033_v15 = vld [vmem:[%s2312_s9 + $0x80] sm:$0xff] }
 0x17b   : > { %v693_v47 = vpop.permute.xlu1 %692  ;;  %v691_v48 = vpop.permute.xlu0 %690  ;;  %1563 = vmatprep.subr.bf16.mxu0 %v1783_v61 }
 0x17c   : > { %v715_v51 = vsel %vm713_vm8, %v712_v49, %v693_v47  ;;  %v714_v52 = vsel %vm713_vm8, %v711_v50, %v691_v48 }
 0x17e   : > { %1565 = vmatpush1.bf16.msra.mxu0 %v1564_v18  ;;  %v1572_v18 = vpack.c.bf16 %v1034_v16, %v1033_v15 }
 0x17f   : > { %v704_v53 = vpop.permute.xlu1 %703  ;;  %v702_v54 = vpop.permute.xlu0 %701  ;;  %1566 = vmatprep.subr.bf16.mxu0 %v1783_v61 }
 0x180   : > { %v718_v55 = vsel %vm716_vm9, %v715_v51, %v704_v53  ;;  %v717_v56 = vsel %vm716_vm9, %v714_v52, %v702_v54  ;;  %1573 = vmatprep.subr.bf16.mxu1 %v1572_v18 }
 0x181   : > { %1512 = vmatprep.mubr.msk.f32.mxu1 %vm724_vm10, %v717_v56 }
 0x182   : > { %1513 = vmatmul.mubr.msk.f32.vlgmr.msra.gmra.mrb[2].mxu1 %vm724_vm10, %v718_v55  ;;  %1568 = vmatpush1.bf16.msra.mxu0 %v1567_v21  ;;  %v1574_v21 = vpack.c.bf16 %v1018_v19, %v1017_v17 }
 0x183   : > { %1569 = vmatprep.subr.bf16.mxu0 %v1783_v61 }
 0x184   : > { %1575 = vmatpush3.bf16.msra.mxu1 %v1574_v21 }
 0x186   : > { %1571 = vmatpush1.bf16.msra.mxu0 %v1570_v36  ;;  %v1024_v36 = vld [vmem:[%s2312_s9 + $0x38] sm:$0xff] }
 0x187   : > { %1604 = vmatprep.subr.bf16.mxu0 %v1783_v61 }
 0x255   : > { %v1514_v23 = vpop.f32.mrb[2].mxu1 }
 0x256   : > { %v814_v25 = vmul.f32 %v1514_v23, %v1429_v22  ;;  %v797_v26 = vpop.f32.mrb[3].mxu1  ;;  %v1019_v23 = vld [vmem:[%s2312_s9 + $0x10] sm:$0xff] }
 0x257   : > { %v813_v27 = vmul.f32 %v1429_v22, %v797_v26  ;;  %v1038_v26 = vld [vmem:[%s2312_s9 + $0xa8] sm:$0xff] }
 0x258   : > { %v823_v28 = vadd.f32 %v1430_v24, %v814_v25  ;;  %v1037_v25 = vld [vmem:[%s2312_s9 + $0xa0] sm:$0xff] }
 0x259   : > { %v822_v29 = vadd.f32 %v1430_v24, %v813_v27  ;;  %v1020_v24 = vld [vmem:[%s2312_s9 + $0x18] sm:$0xff] }
 0x25a   : > { %1676 = vtanh.f32 %v823_v28  ;;  %v1578_v27 = vpack.c.bf16 %v1020_v24, %v1019_v23  ;;  %v1580_v28 = vpack.c.bf16 %v1038_v26, %v1037_v25  ;;  %v1437_v25 = vld [vmem:[#allocation5] ss:$0 sm:$0xff] }
 0x25b   : > { %1678 = vtanh.f32 %v822_v29  ;;  %v1021_v29 = vld [vmem:[%s2312_s9 + $0x20] sm:$0xff] }
 0x264   : > { %v1677_v30 = vpop.eup %1676 }
 0x265   : > { %v1679_v32 = vpop.eup %1678  ;;  %827 = vst [vmem:[#allocation2 + $0x8] sm:$0xff] %v1677_v30  ;;  %v1022_v30 = vld [vmem:[%s2312_s9 + $0x28] sm:$0xff] }
 0x266   : > { %826 = vst [vmem:[#allocation2] sm:$0xff] %v1679_v32  ;;  %v1040_v32 = vld [vmem:[%s2312_s9 + $0xb8] sm:$0xff]  ;;  %v1582_v33 = vpack.c.bf16 %v1022_v30, %v1021_v29 }
 0x267   : > { %v1584_v34 = vpack.c.bf16 %v1040_v32, %v1039_v31 }
 0x26d   : > { %v828_v38 = vld [vmem:[#allocation2] ss:$2 sm:$0xff]  ;;  %v830_v39 = vld [vmem:[#allocation2 + $0x1] ss:$2 sm:$0xff] }
 0x26e   : > { %vm831_vm11 = vcmp.gt.f32.partialorder %v830_v39, %v828_v38 }
 0x26f   : > { %v832_v40 = vsel %vm831_vm11, %v830_v39, %v828_v38  ;;  %v833_v41 = vsel %vm831_vm11, 1, %v1782_v57  ;;  %v1041_v38 = vld [vmem:[%s2312_s9 + $0xc0] sm:$0xff]  ;;  %v1042_v39 = vld [vmem:[%s2312_s9 + $0xc8] sm:$0xff] }
 0x270   : > { %v839_v42 = vrot.slane %v832_v40, 6  ;;  %v837_v43 = vadd.s32 %v2050_v37, %v833_v41  ;;  %v1586_v40 = vpack.c.bf16 %v1024_v36, %v1023_v35  ;;  %v1588_v41 = vpack.c.bf16 %v1042_v39, %v1041_v38  ;;  %v1435_v38 = vld [vmem:[%s2313_s10] ss:$0 sm:$0xff] }
 0x272   : > { %v841_v44 = vsel %vm649_vm2, 0.0, %v839_v42  ;;  %v842_v45 = vsel %vm649_vm2, %v839_v42, 0.0  ;;  %1237 = vst [vmem:[%s546_s27] sm:$0xff] %v837_v43  ;;  %v1025_v42 = vld [vmem:[%s2312_s9 + $0x40] sm:$0xff]  ;;  %v1026_v43 = vld [vmem:[%s2312_s9 + $0x48] sm:$0xff]  ;;  %s1265_s27 = sshll.u32 %s519_s22, 4  ;;  %s2229_s27 = int_to_ptr.vmem [resolvable:$true] %s1265_s27 }
 0x273   : > { %v863_v46 = vrot.slane %v841_v44, 4  ;;  %v864_v47 = vrot.slane %v842_v45, 4  ;;  %v851_v48 = vrot.slane %v841_v44, 2  ;;  %v852_v49 = vrot.slane %v842_v45, 2 }
 0x274   : > { %v845_v50 = vrot.slane %v841_v44, 1  ;;  %v846_v51 = vrot.slane %v842_v45, 1  ;;  %v857_v55 = vrot.slane %v841_v44, 3  ;;  %v858_v56 = vrot.slane %v842_v45, 3  ;;  %v1044_v45 = vld [vmem:[%s2312_s9 + $0xd8] sm:$0xff] }
 0x275   : > { %v865_v52 = vsel %vm568_vm0, %v863_v46, %v864_v47  ;;  %v853_v53 = vsel %vm672_vm3, %v851_v48, %v852_v49  ;;  %v1590_v46 = vpack.c.bf16 %v1026_v43, %v1025_v42  ;;  %v1027_v48 = vld [vmem:[%s2312_s9 + $0x50] sm:$0xff]  ;;  %v1028_v49 = vld [vmem:[%s2312_s9 + $0x58] sm:$0xff] }
 0x276   : > { %1431 = vmatprep.mubr.msk.f32.mxu0 %vm716_vm9, %v865_v52  ;;  %854 = vrot.lane.b32.xlu1 %v853_v53, %s2324_s29  ;;  %v847_v54 = vsel %vm660_vm4, %v845_v50, %v846_v51  ;;  %v859_v58 = vsel %vm684_vm5, %v857_v55, %v858_v56  ;;  %v1045_v50 = vld [vmem:[%s2312_s9 + $0xe0] sm:$0xff]  ;;  %v1046_v51 = vld [vmem:[%s2312_s9 + $0xe8] sm:$0xff]  ;;  %v1594_v52 = vpack.c.bf16 %v1028_v49, %v1027_v48  ;;  %s1241_s29 = scalar_lea.sflag [#allocation7], %s2217_s0 }
 0x277   : > { %848 = vrot.lane.b32.xlu0 %v847_v54, %s1781_s19  ;;  %v1596_v53 = vpack.c.bf16 %v1046_v51, %v1045_v50  ;;  %v1029_v54 = vld [vmem:[%s2312_s9 + $0x60] sm:$0xff]  ;;  %v1030_v55 = vld [vmem:[%s2312_s9 + $0x68] sm:$0xff]  ;;  %s2227_s19 = scalar_lea.hbm %s2316_s13, %s1438_s18 }
 0x278   : > { %v1598_v56 = vpack.c.bf16 %v1030_v55, %v1029_v54 }
 0x27b   : > { %860 = vrot.lane.b32.xlu0 %v859_v58, %s1785_s30  ;;  %v1432_v58 = vld [vmem:[%s2310_s7] ss:$0 sm:$0xff]  ;;  %s2325_s30 = scalar_lea.vmem [#allocation8], %s2217_s0 }
 0x27c   : > { %s1284_s20 = sshll.u32 %s2325_s30, 4  ;;  %s2238_s20 = int_to_ptr.vmem [resolvable:$true] %s1284_s20 }
 0x27f   : > { %1223 = vperm.xlu0 %1675, %v1437_v25  }
 0x2e8   : > { %v855_v60 = vpop.permute.xlu1 %854 }
 0x2e9   : > { %v849_v59 = vpop.permute.xlu0 %848 }
 0x2ea   : > { %v866_v62 = vsel %vm716_vm9, %v841_v44, %v849_v59  ;;  %v1043_v44 = vld [vmem:[%s2312_s9 + $0xd0] sm:$0xff] }
 0x2eb   : > { %v868_v0 = vsel %vm867_vm12, %v866_v62, %v855_v60  ;;  %v1592_v47 = vpack.c.bf16 %v1044_v45, %v1043_v44  ;;  %v1433_v60 = vld [vmem:[%s2311_s8] ss:$0 sm:$0xff] }
 0x2ed   : > { %v861_v63 = vpop.permute.xlu0 %860 }
 0x2ee   : > { %v870_v1 = vsel %vm869_vm13, %v868_v0, %v861_v63 }
 0x2ef   : > { %958 = vmatmul.mubr.f32.vlgmr.msra.gmra.mrb[0].mxu0 %v870_v1 }
 0x2f0   : > { %1531 = vmatprep.mubr.msk.f32.mxu0 %vm1786_vm14, %v1787_v7  ;;  %1606 = vmatpush3.bf16.msra.mxu0 %v1605_v5  ;;  %v1048_v7 = vld [vmem:[%s2312_s9 + $0xf8] sm:$0xff] }
 0x2f1   : > { %1607 = vmatprep.subr.bf16.mxu0 %v1783_v61  ;;  %v1600_v10 = vpack.c.bf16 %v1048_v7, %v1047_v6 }
 0x2f4   : > { %1609 = vmatpush3.bf16.msra.mxu0 %v1608_v8  ;;  %v1031_v8 = vld [vmem:[%s2312_s9 + $0x70] sm:$0xff] }
 0x2f5   : > { %1610 = vmatprep.subr.bf16.mxu0 %v1783_v61 }
 0x2f8   : > { %1612 = vmatpush3.bf16.msra.mxu0 %v1611_v11  ;;  %v1032_v11 = vld [vmem:[%s2312_s9 + $0x78] sm:$0xff] }
 0x2f9   : > { %1613 = vmatprep.subr.bf16.mxu0 %v1783_v61  ;;  %v1035_v61 = vld [vmem:[%s2312_s9 + $0x90] sm:$0xff] }
 0x2fa   : > { %v1576_v22 = vpack.c.bf16 %v1036_v20, %v1035_v61 }
 0x2fc   : > { %1615 = vmatpush3.bf16.msra.mxu0 %v1614_v14  ;;  %1577 = vmatprep.subr.bf16.mxu1 %v1576_v22  ;;  %v1602_v14 = vpack.c.bf16 %v1032_v11, %v1031_v8 }
 0x2fd   : > { %1579 = vmatpush3.bf16.msra.mxu1 %v1578_v27 }
 0x2fe   : > { %1581 = vmatprep.subr.bf16.mxu1 %v1580_v28  ;;  %v1224_v42 = vpop.permute.xlu0 %1223 }
 0x301   : > { %1583 = vmatpush3.bf16.msra.mxu1 %v1582_v33 }
 0x302   : > { %1585 = vmatprep.subr.bf16.mxu1 %v1584_v34 }
 0x305   : > { %1587 = vmatpush3.bf16.msra.mxu1 %v1586_v40  ;;  %v1436_v40 = vld [vmem:[%s2314_s11] ss:$0 sm:$0xff] }
 0x306   : > { %1589 = vmatprep.subr.bf16.mxu1 %v1588_v41 }
 0x309   : > { %1591 = vmatpush3.bf16.msra.mxu1 %v1590_v46 }
 0x30a   : > { %1593 = vmatprep.subr.bf16.mxu1 %v1592_v47 }
 0x30d   : > { %1595 = vmatpush3.bf16.msra.mxu1 %v1594_v52 }
 0x30e   : > { %1597 = vmatprep.subr.bf16.mxu1 %v1596_v53 }
 0x311   : > { %1599 = vmatpush3.bf16.msra.mxu1 %v1598_v56 }
 0x312   : > { %1601 = vmatprep.subr.bf16.mxu1 %v1600_v10 }
 0x315   : > { %1603 = vmatpush3.bf16.msra.mxu1 %v1602_v14 }
 0x3c2   : > { %v959_v59 = vpop.f32.mrb[0].mxu0 }
 0x3c3   : > { %v970_v62 = vmul.f32 %v1432_v58, %v959_v59  ;;  %v961_v63 = vpop.f32.mrb[1].mxu0 }
 0x3c5   : > { %v978_v0 = vadd.f32 %v1433_v60, %v970_v62 }
 0x3c7   : > { %1680 = vtanh.f32 %v978_v0 }
 0x3d1   : > { %v1681_v1 = vpop.eup %1680 }
 0x3d2   : > { %980 = vst [vmem:[#allocation3] sm:$0xff] %v1681_v1 }
 0x3d9   : > { %v981_v2 = vld [vmem:[#allocation3] ss:$2 sm:$0x7]  ;;  %v983_v3 = vld [vmem:[#allocation3 + $0x1] ss:$2 sm:$0x7] }
 0x3da   : > { %vm984_vm15 = vcmp.gt.f32.partialorder %v983_v3, %v981_v2  ;;  %v988_v4 = vld [vmem:[#allocation3 + $0x2] ss:$2 sm:$0x7]  ;;  %v993_v13 = vld [vmem:[#allocation3 + $0x3] ss:$2 sm:$0x7] }
 0x3db   : > { %v985_v5 = vsel %vm984_vm15, %v983_v3, %v981_v2  ;;  %v986_v9 = vsel %vm984_vm15, 1, %v1782_v57 }
 0x3dc   : > { %vm989_vm0 = vcmp.gt.f32.partialorder %v988_v4, %v985_v5 }
 0x3dd   : > { %v990_v12 = vsel %vm989_vm0, %v988_v4, %v985_v5  ;;  %v991_v15 = vsel %vm989_vm0, 2, %v986_v9 }
 0x3de   : > { %vm994_vm1 = vcmp.gt.f32.partialorder %v993_v13, %v990_v12 }
 0x3df   : > { %v995_v16 = vsel %vm994_vm1, %v993_v13, %v990_v12  ;;  %v996_v17 = vsel %vm994_vm1, 3, %v991_v15 }
 0x3e0   : > { %v999_v18 = vrot.slane %v995_v16, 6  ;;  %v997_v19 = vadd.s32 %v996_v17, %v2050_v37 }
 0x3e2   : > { %v1001_v61 = vsel %vm649_vm2, 0.0, %v999_v18  ;;  %1238 = vst [vmem:[%s550_s1] sm:$0x7] %v997_v19  ;;  %s1682_s1 = scalar_lea.vmem %s2229_s27, 16 }
 0x3e3   : > { %v1002_v20 = vsel %vm684_vm5, %v1001_v61, 0.0  ;;  %p1683_p11 = scmp.ne.s32.totalorder %s2229_s27, %s1682_s1 }
 0x3e4   : > { %v1014_v21 = vrot.slane %v1002_v20, 4  ;;  %v1004_v22 = vrot.slane %v1002_v20, 1  ;;  %v1010_v23 = vrot.slane %v1002_v20, 3  ;;  %v1008_v29 = vrot.slane %v1002_v20, 2 }
 0x3e5   : > { %p1684_p12 = pnand %p1683_p11, %p1916_p5 }
 0x3e6   : > { %1532 = vmatmul.mubr.msk.f32.vlgmr.msra.gmra.mrb[2].mxu0 %vm867_vm12, %v1014_v21  ;;  %v1670_v24 = vpack.i.bf16 %v1004_v22, %v1010_v23 }
 0x3e7   : > { %p1685_p13 = pneg %p1684_p12 }
 0x3e8   : > { %1671 = vrot.lane.b32.xlu1 %v1670_v24, %s2338_s21  ;;  %s1788_s21 = smov [#allocation6]  }
 0x3e9   : > { %s1686_s30 = sshll.u32 %s1788_s21, 4  ;;  %s1687_s30 = int_to_ptr.vmem [resolvable:$false] %s1686_s30 }
 0x3ea   : > { %s1688_s2 = scalar_lea.vmem %s1687_s30, 32  ;;  %p1689_p0 = scmp.lt.s32.totalorder %s2229_s27, %s1687_s30 }
 0x3eb   : > { %p1690_p1 = scmp.lt.s32.totalorder %s1688_s2, %s1682_s1 }
 0x3ed   : > { %p1691_p2 = por %p1690_p1, %p1689_p0 }
 0x3ef   : > { %p1692_p3 = pnand %p1691_p2, %p1685_p13 }
 0x45a   : > { %v1672_v26 = vpop.permute.xlu1 %1671 }
 0x45b   : > { %v1674_v27 = vunpack.i.h.bf16 %v1672_v26  ;;  %v1673_v28 = vunpack.i.l.bf16 %v1672_v26 }
 0x45d   : > { %v1016_v30 = vsel %vm867_vm12, %v1008_v29, %v1673_v28  ;;  %v1015_v31 = vsel %vm867_vm12, %v1002_v20, %v1674_v27 }
 0x45e   : > { %1123 = vmatprep.mubr.f32.mxu1 %v1016_v30 }
 0x45f   : > { %1124 = vmatmul.mubr.f32.vlgmr.msra.gmra.mrb[4].mxu1 %v1015_v31 }
 0x4b9   : > { %v1195_v32 = vpop.f32.mrb[2].mxu0 }
 0x4ba   : > { %v1533_v33 = vpop.f32.mrb[3].mxu0 }
 0x532   : > { %v1485_v34 = vpop.f32.mrb[4].mxu1 }
 0x533   : > { %v1486_v35 = vpop.f32.mrb[5].mxu1 }
 0x534   : > { %v1487_v36 = vadd.f32 %v1486_v35, %v1485_v34 }
 0x536   : > { %v1196_v39 = vadd.f32 %v1487_v36, %v1195_v32 }
 0x538   : > { %v1206_v41 = vmul.f32 %v1435_v38, %v1196_v39 }
 0x53a   : > { %v1214_v43 = vadd.f32 %v1436_v40, %v1206_v41 }
 0x53c   : > { %vm1215_vm2 = vcmp.gt.f32.partialorder %v1214_v43, 0.0  ;;  %v1226_v44 = vmul.f32 %v1224_v42, %v1214_v43 }
 0x53e   : > { %v1227_v45 = vsel %vm1215_vm2, %v1214_v43, %v1226_v44 }
 0x53f   : > { %1228 = vst [vmem:[#allocation4] sm:$0x7] %v1227_v45 }
 0x546   : > { %v1229_v46 = vld [vmem:[#allocation4] ss:$2 sm:$0x1]  ;;  %v1231_v47 = vld [vmem:[#allocation4 + $0x1] ss:$2 sm:$0x1] }
 0x547   : > { %vm1232_vm3 = vcmp.gt.f32.partialorder %v1231_v47, %v1229_v46 }
 0x548   : > { %v1233_v48 = vsel %vm1232_vm3, %v1231_v47, %v1229_v46  ;;  %v1234_v49 = vsel %vm1232_vm3, 1, %v1782_v57 }
 0x549   : > { %1236 = vst [vmem:[%s519_s22] sm:$0x1] %v1233_v48  ;;  %v1235_v50 = vadd.s32 %v1234_v49, %v2050_v37 }
 0x54a   : > { %1695 = shalt.err (!%p1692_p3)
}
 0x54b   : > { %s1696_s18 = scalar_lea.hbm %s2227_s19, 16  ;;  %s1700_s25 = scalar_lea.hbm %s2316_s13, 32 }
 0x54c   : > { %p1697_p4 = scmp.ne.s32.totalorder %s2227_s19, %s1696_s18  ;;  %p1701_p9 = scmp.lt.u32.totalorder %s2227_s19, %s2316_s13 }
 0x54d   : > { %p1702_p10 = scmp.lt.u32.totalorder %s1700_s25, %s1696_s18  ;;  %p1704_p12 = scmp.lt.u32.totalorder %s1696_s18, %s2227_s19 }
 0x54e   : > { %p1698_p7 = pnand %p1697_p4, %p1916_p5 }
 0x54f   : > { %p1703_p11 = por %p1702_p10, %p1701_p9 }
 0x550   : > { %p1699_p8 = pneg %p1698_p7 }
 0x551   : > { %p1705_p13 = por %p1704_p12, %p1703_p11 }
 0x553   : > { %p1706_p0 = pnand %p1705_p13, %p1699_p8 }
 0x555   : > { %1709 = shalt.err (!%p1706_p0)
}
 0x556   : > { %1616 = dma.vmem_to_hbm [thread:$0]  (%p1916_p5), %s2229_s27, 16, %s2227_s19, %s1241_s29  }
 0x557   : > { %s2339_s2 = scalar_lea.vmem [#allocation8], %s2217_s0  ;;  %s1253_s1 = scalar_lea.sflag [#allocation9], %s2217_s0 }
 0x558   : > { %1239 = vst [vmem:[%s2339_s2] sm:$0x1] %v1235_v50  ;;  %s1710_s22 = scalar_lea.vmem %s2238_s20, 16  ;;  %s1789_s18 = smov [#allocation8]  }
 0x559   : > { %p1711_p1 = scmp.ne.s32.totalorder %s2238_s20, %s1710_s22  ;;  %s1714_s12 = sshll.u32 %s1789_s18, 4  ;;  %s1715_s12 = int_to_ptr.vmem [resolvable:$false] %s1714_s12 }
 0x55a   : > { %s1716_s25 = scalar_lea.vmem %s1715_s12, 32  ;;  %p1717_p4 = scmp.lt.s32.totalorder %s2238_s20, %s1715_s12 }
 0x55b   : > { %p1712_p2 = pnand %p1711_p1, %p1916_p5  ;;  %p1718_p7 = scmp.lt.s32.totalorder %s1716_s25, %s1710_s22 }
 0x55d   : > { %p1713_p3 = pneg %p1712_p2  ;;  %p1719_p8 = por %p1718_p7, %p1717_p4 }
 0x55f   : > { %p1720_p9 = pnand %p1719_p8, %p1713_p3 }
 0x561   : > { %1723 = shalt.err (!%p1720_p9)
}
 0x562   : > { %s1724_s0 = scalar_lea.hbm %s2236_s28, 16  ;;  %s1728_s29 = scalar_lea.hbm %s2319_s16, 32 }
 0x563   : > { %p1725_p10 = scmp.ne.s32.totalorder %s2236_s28, %s1724_s0  ;;  %p1729_p13 = scmp.lt.u32.totalorder %s2236_s28, %s2319_s16 }
 0x564   : > { %p1730_p0 = scmp.lt.u32.totalorder %s1728_s29, %s1724_s0  ;;  %p1732_p2 = scmp.lt.u32.totalorder %s1724_s0, %s2236_s28 }
 0x565   : > { %p1726_p11 = pnand %p1725_p10, %p1916_p5 }
 0x566   : > { %p1731_p1 = por %p1730_p0, %p1729_p13 }
 0x567   : > { %p1727_p12 = pneg %p1726_p11 }
 0x568   : > { %p1733_p3 = por %p1732_p2, %p1731_p1 }
 0x56a   : > { %p1734_p4 = pnand %p1733_p3, %p1727_p12 }
 0x56c   : > { %1737 = shalt.err (!%p1734_p4)
}
 0x56d   : > { %1617 = dma.vmem_to_hbm [thread:$0]  (%p1916_p5), %s2238_s20, 16, %s2236_s28, %s1253_s1  }
 0x56e PF: > { %p1627_p7 = scmp.ge.s32.totalorder %s1776_s26, 2  ;;  %s1296_s22 = sand.u32 1, %s1764_s23  }
 0x56f   : > { %s1297_s18 = scalar_lea.sflag [#allocation7], %s1296_s22 }
 0x570   : > { %p1621_p8 = pnand %p1627_p7, %p1920_p6 }
 0x572   : > { %1755 = dma.done.wait (!%p1621_p8), %s1297_s18, 16  }
 0x573   : > { %1757 = vsyncadd (!%p1621_p8), %s1297_s18, 4294967280  ;;  %s1319_s12 = scalar_lea.sflag [#allocation9], %s1296_s22 }
 0x574   : > { %1759 = dma.done.wait (!%p1621_p8), %s1319_s12, 16  }
 0x575   : > { %1761 = vsyncadd (!%p1621_p8), %s1319_s12, 4294967280  ;;  %s2341_s26 = sld [smem:[#allocation13_spill]]  ;;  %s2342_s17 = sld [smem:[#allocation12_spill]] }
 0x576   : > { %s2343_s25 = sld [smem:[#allocation14_spill]]  ;;  %s2344_s23 = smov %s1768_s24 }
 0x57b   : > { %p32_p5 = scmp.ge.s32.totalorder %s2341_s26, 4   ;;  %s2345_s24 = smov %s2342_s17 }
 0x57d   :  { %34 = sbr.rel (!%p32_p5) target bundleno = 9 (0x9), region = 153 }
 0x584   :  { %1323 = vsyncpa [#allocation7], 1 }
 0x585   :  { %1325 = vsyncpa [#allocation7 + $0x1], 1 }
 0x586   :  { %1326 = vsyncpa [#allocation9], 1 }
 0x587   :  { %1328 = vsyncpa [#allocation9 + $0x1], 1 }

</bundles_post_ra>
